<compile_context>
chip_gen: v5e
topology: v5e:2x2
jax: 0.10.0
libtpu: 0.0.40
codegen_flags: <defaults>
</compile_context>

<pallas_src>
import functools
import re

import jax
import jax.numpy as jnp
from jax.experimental import pallas as pl
from jax.experimental.pallas import tpu as pltpu


def _round_up(n, m):
    return ((n + m - 1) // m) * m


def _tpu_generation():
    """Best-effort TPU generation sniff (5, 6, 7, ...). 0 if unknown."""
    try:
        kind = jax.devices()[0].device_kind
    except Exception:
        return 0
    m = re.search(r"(\d+)", kind)
    return int(m.group(1)) if m else 0


def _tpu_vmem_capacity_bytes():
    try:
        return int(pltpu.get_tpu_info().vmem_capacity_bytes)
    except Exception:
        return 64 << 20  # conservative fallback: v7x per-TensorCore VMEM


# --------------------------------------------------------------------------- #
# Kernel
# --------------------------------------------------------------------------- #
def ffnet_kernel(x_ref, w1_ref, w2_ref, w3_ref, b_ref, o_ref, *,
                 bf16_elemwise, n_split):
    h_pad = w1_ref.shape[1]
    n_out = o_ref.shape[1]
    tile_b = o_ref.shape[0]

    bias = b_ref[...]                      # (8, bias_p) f32 -- one tiny load
    b1 = bias[0:1, :h_pad]
    b2 = bias[1:2, :h_pad]
    b3 = bias[2:3, :n_out]
    if bf16_elemwise:                      # v6e/v7x have a bf16 VALU
        b1 = b1.astype(jnp.bfloat16)
        b2 = b2.astype(jnp.bfloat16)

    def chain(xb):
        # fc1 + ReLU (bf16 MXU operands, f32 accumulate)
        h1 = jnp.dot(xb, w1_ref[...], preferred_element_type=jnp.float32)
        if bf16_elemwise:
            h1 = jnp.maximum(h1.astype(jnp.bfloat16) + b1, 0)
        else:                              # v5e: keep elementwise in f32
            h1 = jnp.maximum(h1 + b1, 0.0).astype(jnp.bfloat16)
        # fc2 + ReLU
        h2 = jnp.dot(h1, w2_ref[...], preferred_element_type=jnp.float32)
        if bf16_elemwise:
            h2 = jnp.maximum(h2.astype(jnp.bfloat16) + b2, 0)
        else:
            h2 = jnp.maximum(h2 + b2, 0.0).astype(jnp.bfloat16)
        # fc3 (no activation), f32 output
        out = jnp.dot(h2, w3_ref[...], preferred_element_type=jnp.float32)
        return (out + b3).astype(o_ref.dtype)

    if n_split > 1:
        # Two independent sub-chains per tile give the scheduler MXU filler
        # while the other half's bias/ReLU/cast is on the VPU / result FIFO.
        half = tile_b // n_split
        for s in range(n_split):
            lo, hi = s * half, (s + 1) * half
            o_ref[lo:hi, :] = chain(x_ref[lo:hi, :].astype(jnp.bfloat16))
    else:
        o_ref[...] = chain(x_ref[...].astype(jnp.bfloat16))


# --------------------------------------------------------------------------- #
# Host-side wrappers
# --------------------------------------------------------------------------- #
def prepare_ffnet_params(params):
    """One-time pad/cast of weights into a resident-in-VMEM, MXU-friendly layout.

    Hoisted out of the per-call path so a forward pass is a single pallas_call.
    """
    gen = _tpu_generation()
    w1, b1, w2, b2, w3, b3 = (params["w1"], params["b1"], params["w2"],
                              params["b2"], params["w3"], params["b3"])
    n_in, h = w1.shape
    n_out = w3.shape[1]

    # 256-wide K/N only helps the 256x256 MXUs (v6e/v7x) and only when the real
    # hidden dim already exceeds 128; otherwise it just adds padding FLOPs.
    align = 256 if (gen >= 6 and h > 128) else 128
    h_pad = _round_up(h, align)
    bias_p = max(h_pad, _round_up(n_out, 128))

    bf16 = jnp.bfloat16
    # K-dim of w1 stays at natural n_in; zero rows/cols keep math exact.
    w1p = jnp.zeros((n_in, h_pad), bf16).at[:, :h].set(w1.astype(bf16))
    w2p = jnp.zeros((h_pad, h_pad), bf16).at[:h, :h].set(w2.astype(bf16))
    w3p = jnp.zeros((h_pad, n_out), bf16).at[:h, :].set(w3.astype(bf16))
    # All three biases packed into a single (8, bias_p) f32 buffer -> one DMA.
    bp = jnp.zeros((8, bias_p), jnp.float32)
    bp = bp.at[0, :h].set(b1.reshape(-1).astype(jnp.float32))
    bp = bp.at[1, :h].set(b2.reshape(-1).astype(jnp.float32))
    bp = bp.at[2, :n_out].set(b3.reshape(-1).astype(jnp.float32))

    return dict(w1=w1p, w2=w2p, w3=w3p, bias=bp,
                n_in=n_in, h=h, n_out=n_out, h_pad=h_pad, bias_p=bias_p, gen=gen)


def _pick_tile_b(B, per_row, x_budget, requested):
    """Largest batch tile that fits the remaining VMEM budget."""
    fit = max(8, x_budget // per_row)
    tile = min(int(requested), int(fit), 4096)
    if B >= 32:
        # Keep >= 2 batch tiles so ("parallel",) can shard across v7x's 2 TCs.
        tile = min(tile, _round_up((B + 1) // 2, 16))
    tile = min(tile, _round_up(B, 8))
    if tile >= 16:
        tile = (tile // 16) * 16   # even halves for the in-kernel 2-way split
    else:
        tile = 8
    return tile


def ffnet_forward(x, prepped, *, tile_b=2048):
    """x: (B, n_in) float32.  prepped: output of prepare_ffnet_params()."""
    B, n_in = x.shape
    assert n_in == prepped["n_in"], "input width mismatch"
    n_out, h_pad, gen = prepped["n_out"], prepped["h_pad"], prepped["gen"]
    w1p, w2p, w3p, bp = prepped["w1"], prepped["w2"], prepped["w3"], prepped["bias"]

    # Generation-aware VMEM budget (v5e/v6e ~128 MiB, v7x 64 MiB per TC).
    cap = _tpu_vmem_capacity_bytes()
    budget = min(int(cap * 0.85), cap - (8 << 20))
    # Resident inputs are double-buffered by the default pipeliner -> count 2x.
    weights_resident = 2 * (2 * (w1p.size + w2p.size + w3p.size) + 4 * bp.size)
    # Per batch row: double-buffered f32 x + out blocks, plus generous in-flight
    # f32/bf16 intermediates for one tile.
    per_row = 2 * 4 * n_in + 2 * 4 * n_out + 4 * 4 * h_pad + 2 * n_in
    if weights_resident + 16 * per_row > budget:
        # TODO(synk): add a hidden-dim-tiled (grid over h blocks + VMEM scratch
        # accumulator) fallback for hidden sizes whose weights exceed VMEM.
        raise ValueError(
            f"FFNet weights ({weights_resident} B double-buffered) exceed the "
            f"{budget} B VMEM budget; hidden-dim tiling not implemented.")

    tile_b = _pick_tile_b(B, per_row, budget - weights_resident, tile_b)
    grid = (pl.cdiv(B, tile_b),)
    n_split = 2 if (tile_b >= 32 and tile_b % 16 == 0) else 1
    bf16_elemwise = gen >= 6

    needed = weights_resident + tile_b * per_row
    vmem_limit = int(min(max(needed + (4 << 20), 32 << 20), cap - (2 << 20)))

    flops = 2 * B * (n_in * h_pad + h_pad * h_pad + h_pad * n_out)
    bytes_accessed = (x.size * 4 + (w1p.size + w2p.size + w3p.size) * 2
                      + bp.size * 4 + B * n_out * 4)

    kernel = functools.partial(ffnet_kernel, bf16_elemwise=bf16_elemwise,
                               n_split=n_split)
    resident = lambda a: pl.BlockSpec(a.shape, lambda i: (0,) * a.ndim)

    return pl.pallas_call(
        kernel,
        out_shape=jax.ShapeDtypeStruct((B, n_out), jnp.float32),
        grid=grid,
        in_specs=[
            # x at natural width: no padded/cast HBM copy; bf16 cast in-kernel.
            pl.BlockSpec((tile_b, n_in), lambda i: (i, 0)),
            resident(w1p), resident(w2p), resident(w3p), resident(bp),
        ],
        # Output at natural (B, n_out): masked tail store, but far less HBM
        # write traffic for small n_out and no post-slice pass in XLA.
        out_specs=pl.BlockSpec((tile_b, n_out), lambda i: (i, 0)),
        compiler_params=pltpu.CompilerParams(
            dimension_semantics=("parallel",),   # shards batch tiles over TCs
            vmem_limit_bytes=vmem_limit,
        ),
        cost_estimate=pl.CostEstimate(
            flops=flops, transcendentals=0, bytes_accessed=bytes_accessed),
    )(x, w1p, w2p, w3p, bp)


# --------------------------------------------------------------------------- #
# Reference / test harness
# --------------------------------------------------------------------------- #
def init_params(key, n_in, h_size, n_out):
    """Deterministic init mimicking nn.Linear default (uniform +/- 1/sqrt(fan_in))."""
    ks = jax.random.split(key, 6)

    def lin(kw, kb, fan_in, fan_out):
        bound = 1.0 / jnp.sqrt(fan_in)
        w = jax.random.uniform(kw, (fan_in, fan_out), jnp.float32, -bound, bound)
        b = jax.random.uniform(kb, (1, fan_out), jnp.float32, -bound, bound)
        return w, b

    w1, b1 = lin(ks[0], ks[1], n_in, h_size)
    w2, b2 = lin(ks[2], ks[3], h_size, h_size)
    w3, b3 = lin(ks[4], ks[5], h_size, n_out)
    return dict(w1=w1, b1=b1, w2=w2, b2=b2, w3=w3, b3=b3)


def _reference(x, p):
    h = jnp.maximum(x @ p["w1"] + p["b1"], 0.0)
    h = jnp.maximum(h @ p["w2"] + p["b2"], 0.0)
    return h @ p["w3"] + p["b3"]


if __name__ == "__main__":
    key = jax.random.PRNGKey(0)
    k_x, k_p, k_x2 = jax.random.split(key, 3)

    B, n_in, h_size, n_out = 8, 16, 32, 8
    x = jax.random.normal(k_x, (B, n_in), jnp.float32)
    params = init_params(k_p, n_in, h_size, n_out)
    prepped = prepare_ffnet_params(params)   # one-time weight pad/cast

    # Small-batch case (single grid step, no sub-split).
    out = jax.block_until_ready(ffnet_forward(x, prepped))
    expected = _reference(x, params)
    assert out.shape == (B, n_out)
    # bf16 matmul operands -> loosened tolerance vs the f32 reference.
    assert jnp.allclose(out, expected, atol=5e-2, rtol=5e-2)

    # Larger non-multiple batch: exercises multi-tile grid, the partial last
    # block (masked writeback) and the in-kernel 2-way sub-split.
    B2 = 300
    x2 = jax.random.normal(k_x2, (B2, n_in), jnp.float32)
    out2 = jax.block_until_ready(ffnet_forward(x2, prepped, tile_b=256))
    expected2 = _reference(x2, params)
    assert out2.shape == (B2, n_out)
    assert jnp.allclose(out2, expected2, atol=5e-2, rtol=5e-2)

    print("KERNEL_OK")
</pallas_src>

<mosaic_0001>
module attributes {stable_mosaic.version = 11 : i64} {
  func.func @ffnet_kernel(%arg0: i32, %arg1: memref<8x16xf32, #tpu.memory_space<vmem>>, %arg2: memref<16x128xbf16, #tpu.memory_space<vmem>>, %arg3: memref<128x128xbf16, #tpu.memory_space<vmem>>, %arg4: memref<128x8xbf16, #tpu.memory_space<vmem>>, %arg5: memref<8x128xf32, #tpu.memory_space<vmem>>, %arg6: memref<8x8xf32, #tpu.memory_space<vmem>>) attributes {dimension_semantics = [#tpu.dimension_semantics<parallel>], iteration_bounds = array<i64: 1>, scalar_prefetch = 0 : i64, scratch_operands = 0 : i64, tpu.core_type = #tpu.core_type<tc>, window_params = [{transform_indices = @transform_0, window_bounds = array<i64: 8, 16>}, {pipeline_mode = #tpu.pipeline_mode<synchronous>, transform_indices = @transform_1, window_bounds = array<i64: 16, 128>}, {pipeline_mode = #tpu.pipeline_mode<synchronous>, transform_indices = @transform_2, window_bounds = array<i64: 128, 128>}, {pipeline_mode = #tpu.pipeline_mode<synchronous>, transform_indices = @transform_3, window_bounds = array<i64: 128, 8>}, {pipeline_mode = #tpu.pipeline_mode<synchronous>, transform_indices = @transform_4, window_bounds = array<i64: 8, 128>}, {transform_indices = @transform_5, window_bounds = array<i64: 8, 8>}]} {
    %c0 = arith.constant 0 : index
    %c0_0 = arith.constant 0 : index
    %0 = vector.load %arg5[%c0, %c0_0] : memref<8x128xf32, #tpu.memory_space<vmem>>, vector<8x128xf32>
    %1 = vector.extract_strided_slice %0 {offsets = [0, 0], sizes = [1, 128], strides = [1, 1]} : vector<8x128xf32> to vector<1x128xf32>
    %2 = vector.extract_strided_slice %0 {offsets = [1, 0], sizes = [1, 128], strides = [1, 1]} : vector<8x128xf32> to vector<1x128xf32>
    %3 = vector.extract_strided_slice %0 {offsets = [2, 0], sizes = [1, 8], strides = [1, 1]} : vector<8x128xf32> to vector<1x8xf32>
    %c0_1 = arith.constant 0 : index
    %c0_2 = arith.constant 0 : index
    %4 = vector.load %arg1[%c0_1, %c0_2] : memref<8x16xf32, #tpu.memory_space<vmem>>, vector<8x16xf32>
    %5 = arith.truncf %4 : vector<8x16xf32> to vector<8x16xbf16>
    %c0_3 = arith.constant 0 : index
    %c0_4 = arith.constant 0 : index
    %6 = vector.load %arg2[%c0_3, %c0_4] : memref<16x128xbf16, #tpu.memory_space<vmem>>, vector<16x128xbf16>
    %cst = arith.constant dense<0.000000e+00> : vector<8x128xf32>
    %7 = tpu.matmul %5, %6, %cst {dimension_numbers = #tpu.dot_dimension_numbers<[1], [0], [0], [1], [0, 0, 1, 1], [], []>} : vector<8x16xbf16>, vector<16x128xbf16>, vector<8x128xf32> -> vector<8x128xf32>
    %8 = vector.broadcast %1 : vector<1x128xf32> to vector<8x128xf32>
    %9 = arith.addf %7, %8 : vector<8x128xf32>
    %cst_5 = arith.constant 0.000000e+00 : f32
    %10 = vector.broadcast %cst_5 : f32 to vector<8x128xf32>
    %11 = arith.maximumf %9, %10 : vector<8x128xf32>
    %12 = arith.truncf %11 : vector<8x128xf32> to vector<8x128xbf16>
    %c0_6 = arith.constant 0 : index
    %c0_7 = arith.constant 0 : index
    %13 = vector.load %arg3[%c0_6, %c0_7] : memref<128x128xbf16, #tpu.memory_space<vmem>>, vector<128x128xbf16>
    %cst_8 = arith.constant dense<0.000000e+00> : vector<8x128xf32>
    %14 = tpu.matmul %12, %13, %cst_8 {dimension_numbers = #tpu.dot_dimension_numbers<[1], [0], [0], [1], [0, 0, 1, 1], [], []>} : vector<8x128xbf16>, vector<128x128xbf16>, vector<8x128xf32> -> vector<8x128xf32>
    %15 = vector.broadcast %2 : vector<1x128xf32> to vector<8x128xf32>
    %16 = arith.addf %14, %15 : vector<8x128xf32>
    %cst_9 = arith.constant 0.000000e+00 : f32
    %17 = vector.broadcast %cst_9 : f32 to vector<8x128xf32>
    %18 = arith.maximumf %16, %17 : vector<8x128xf32>
    %19 = arith.truncf %18 : vector<8x128xf32> to vector<8x128xbf16>
    %c0_10 = arith.constant 0 : index
    %c0_11 = arith.constant 0 : index
    %20 = vector.load %arg4[%c0_10, %c0_11] : memref<128x8xbf16, #tpu.memory_space<vmem>>, vector<128x8xbf16>
    %cst_12 = arith.constant dense<0.000000e+00> : vector<8x8xf32>
    %21 = tpu.matmul %19, %20, %cst_12 {dimension_numbers = #tpu.dot_dimension_numbers<[1], [0], [0], [1], [0, 0, 1, 1], [], []>} : vector<8x128xbf16>, vector<128x8xbf16>, vector<8x8xf32> -> vector<8x8xf32>
    %22 = vector.broadcast %3 : vector<1x8xf32> to vector<8x8xf32>
    %23 = arith.addf %21, %22 : vector<8x8xf32>
    %c0_13 = arith.constant 0 : index
    %c0_14 = arith.constant 0 : index
    %24 = vector.load %arg6[%c0_13, %c0_14] : memref<8x8xf32, #tpu.memory_space<vmem>>, vector<8x8xf32>
    tpu.vector_store %arg6[%c0_13, %c0_14], %23 {strides = array<i32>} : memref<8x8xf32, #tpu.memory_space<vmem>>, vector<8x8xf32>,
    return
  }
  func.func @transform_0(%arg0: i32) -> (i32, i32) {
    %c0_i32 = arith.constant 0 : i32
    %c0_i32_0 = arith.constant 0 : i32
    return %arg0, %c0_i32 : i32, i32
  }
  func.func @transform_1(%arg0: i32) -> (i32, i32) {
    %c0_i32 = arith.constant 0 : i32
    %c0_i32_0 = arith.constant 0 : i32
    %c0_i32_1 = arith.constant 0 : i32
    return %c0_i32, %c0_i32_0 : i32, i32
  }
  func.func @transform_2(%arg0: i32) -> (i32, i32) {
    %c0_i32 = arith.constant 0 : i32
    %c0_i32_0 = arith.constant 0 : i32
    %c0_i32_1 = arith.constant 0 : i32
    return %c0_i32, %c0_i32_0 : i32, i32
  }
  func.func @transform_3(%arg0: i32) -> (i32, i32) {
    %c0_i32 = arith.constant 0 : i32
    %c0_i32_0 = arith.constant 0 : i32
    %c0_i32_1 = arith.constant 0 : i32
    return %c0_i32, %c0_i32_0 : i32, i32
  }
  func.func @transform_4(%arg0: i32) -> (i32, i32) {
    %c0_i32 = arith.constant 0 : i32
    %c0_i32_0 = arith.constant 0 : i32
    %c0_i32_1 = arith.constant 0 : i32
    return %c0_i32, %c0_i32_0 : i32, i32
  }
  func.func @transform_5(%arg0: i32) -> (i32, i32) {
    %c0_i32 = arith.constant 0 : i32
    %c0_i32_0 = arith.constant 0 : i32
    return %arg0, %c0_i32 : i32, i32
  }
}

</mosaic_0001>

<bundles_post_ra>
// kernel: tpu_custom_call.1
= control target key start
LH: loop header
LB: loop body
LE: loop exit
PB: predicated region body
PF: predicated region fallthrough
CT: control target
= control target key end

     0   :  { %10 = vsyncpa [#allocation3], 0  ;;  %s564_s0 = inlined_call_operand.hbm [shape: f32[8,16], index: 0, kind: input, shape index: {}]   ;;  %s565_s1 = inlined_call_operand.hbm [shape: bf16[16,128], index: 1, kind: input, shape index: {}]   ;;  %s566_s2 = inlined_call_operand.vmem [shape: bf16[128,128], index: 2, kind: input, shape index: {}]   ;;  %s567_s3 = inlined_call_operand.vmem [shape: bf16[128,8], index: 3, kind: input, shape index: {}]   ;;  %s568_s4 = inlined_call_operand.hbm [shape: f32[8,128], index: 4, kind: input, shape index: {}]   ;;  %s569_s5 = inlined_call_operand.hbm [shape: f32[8,8], index: 5, kind: output, shape index: {}]  }
   0x1   :  { %11 = vsyncpa [#allocation6], 0  ;;  %s28_s20 = sshll.u32 %s565_s1, 4  ;;  %s29_s20 = int_to_ptr.hbm [resolvable:$true] %s28_s20 }
   0x2   :  { %12 = vsyncpa [#allocation4], 0  ;;  %s468_s21 = smov [#allocation5]   ;;  %s18_s25 = sshll.u32 %s564_s0, 4  ;;  %s19_s25 = int_to_ptr.hbm [resolvable:$true] %s18_s25 }
   0x3   :  { %s30_s22 = sshll.u32 %s468_s21, 4  ;;  %s469_s26 = smov 64   ;;  %s31_s22 = int_to_ptr.vmem [resolvable:$true] %s30_s22 }
   0x4   :  { %s470_s27 = smov 4   ;;  %s471_s28 = smov [#allocation2]  }
   0x5   :  { %36 = dma.hbm_to_vmem [thread:$0]  %s29_s20, 128, %s31_s22, [#allocation6], %s469_s26, %s469_s26, %s470_s27  }
   0x6   :  { %s20_s29 = sshll.u32 %s471_s28, 4  ;;  %s46_s7 = sshll.u32 %s568_s4, 4  ;;  %s21_s29 = int_to_ptr.vmem [resolvable:$true] %s20_s29  ;;  %s47_s7 = int_to_ptr.hbm [resolvable:$true] %s46_s7 }
   0x7   :  { %23 = dma.hbm_to_vmem [thread:$0]  %s19_s25, 128, %s21_s29, [#allocation3]  }
   0x8   :  { %s472_s1 = smov [#allocation7]  }
   0x9   :  { %s48_s8 = sshll.u32 %s472_s1, 4  ;;  %s49_s8 = int_to_ptr.vmem [resolvable:$true] %s48_s8 }
   0xa   :  { %51 = dma.hbm_to_vmem [thread:$0]  %s47_s7, 128, %s49_s8, [#allocation6]  }
   0xb   :  { %462 = dma.done.wait [#allocation3], 128  }
   0xc   :  { %463 = vsyncadd [#allocation3], 4294967168 }
   0xd   :  { %464 = dma.done.wait [#allocation6], 256  }
   0xe   :  { %465 = vsyncadd [#allocation6], 4294967040  ;;  %v343_v0 = vld [vmem:[#allocation5] sm:$0xff]  ;;  %v66_v1 = vld [vmem:[#allocation2] sm:$0xff]  ;;  %vm77_vm0 = vcmask 130048   ;;  %s473_s10 = smov [#allocation8]  }
   0xf   :  { %v351_v2 = vld [vmem:[%s566_s2 + $0x38] sm:$0xff]  ;;  %v67_v3 = vpack.c.bf16 %v66_v1, %v66_v1  ;;  %88 = vmatpush.bf16.msra.mxu0 %v343_v0  ;;  %v350_v4 = vld [vmem:[%s566_s2 + $0x30] sm:$0xff]  ;;  %v349_v5 = vld [vmem:[%s566_s2 + $0x28] sm:$0xff]  ;;  %s261_s11 = sshll.u32 %s473_s10, 4  ;;  %s263_s14 = sshll.u32 %s569_s5, 4  ;;  %vm254_vm1 = vcmask 64512   ;;  %s262_s11 = int_to_ptr.vmem [resolvable:$true] %s261_s11  ;;  %s264_s14 = int_to_ptr.hbm [resolvable:$true] %s263_s14 }
  0x10   :  { %161 = vmatpush.bf16.msra.mxu1 %v351_v2  ;;  %v348_v6 = vld [vmem:[%s566_s2 + $0x20] sm:$0xff]  ;;  %v347_v7 = vld [vmem:[%s566_s2 + $0x18] sm:$0xff]  ;;  %v346_v8 = vld [vmem:[%s566_s2 + $0x10] sm:$0xff] }
  0x11   :  { %v345_v9 = vld [vmem:[%s566_s2 + $0x8] sm:$0xff]  ;;  %v344_v10 = vld [vmem:[%s566_s2] sm:$0xff]  ;;  %v359_v11 = vld [vmem:[%s567_s3 + $0x38] sm:$0xff] }
  0x12   :  { %278 = vmatmul.msk.bf16.vlgmr.msra.gmra.mxu0 %vm77_vm0, %v67_v3  ;;  %241 = vmatpush.bf16.msra.mxu2 %v359_v11  ;;  %v358_v12 = vld [vmem:[%s567_s3 + $0x30] sm:$0xff]  ;;  %v357_v13 = vld [vmem:[%s567_s3 + $0x28] sm:$0xff]  ;;  %v356_v14 = vld [vmem:[%s567_s3 + $0x20] sm:$0xff] }
  0x13   :  { %v355_v15 = vld [vmem:[%s567_s3 + $0x18] sm:$0xff]  ;;  %v65_v16 = vld [vmem:[#allocation7] sm:$0xff]  ;;  %v353_v24 = vld [vmem:[%s567_s3 + $0x8] sm:$0xff] }
  0x14   :  { %162 = vmatpush.bf16.msra.mxu1 %v350_v4  ;;  %v354_v17 = vld [vmem:[%s567_s3 + $0x10] sm:$0xff]  ;;  %v70_v18 = vperm.slane %v65_v16, 0  ;;  %v352_v25 = vld [vmem:[%s567_s3] sm:$0xff]  ;;  %v112_v26 = vperm.slane %v65_v16, 1  ;;  %v192_v32 = vperm.slane %v65_v16, 2 }
  0x16   :  { %242 = vmatpush.bf16.msra.mxu2 %v358_v12 }
  0x18   :  { %163 = vmatpush.bf16.msra.mxu1 %v349_v5 }
  0x1a   :  { %243 = vmatpush.bf16.msra.mxu2 %v357_v13 }
  0x1c   :  { %164 = vmatpush.bf16.msra.mxu1 %v348_v6 }
  0x1e   :  { %244 = vmatpush.bf16.msra.mxu2 %v356_v14 }
  0x20   :  { %165 = vmatpush.bf16.msra.mxu1 %v347_v7 }
  0x22   :  { %245 = vmatpush.bf16.msra.mxu2 %v355_v15 }
  0x24   :  { %166 = vmatpush.bf16.msra.mxu1 %v346_v8 }
  0x26   :  { %246 = vmatpush.bf16.msra.mxu2 %v354_v17 }
  0x28   :  { %167 = vmatpush.bf16.msra.mxu1 %v345_v9 }
  0x2a   :  { %247 = vmatpush.bf16.msra.mxu2 %v353_v24 }
  0x2c   :  { %168 = vmatpush.bf16.msra.mxu1 %v344_v10 }
  0x2e   :  { %248 = vmatpush.bf16.msra.mxu2 %v352_v25 }
  0x8f   :  { %v90_v19 = vpop.f32.mrf.mxu0 }
  0x90   :  { %v91_v20 = vadd.f32 %v90_v19, %v70_v18 }
  0x92   :  { %v94_v21 = vmax.f32 %v91_v20, 0.0 }
  0x94   :  { %v95_v22 = vpack.c.bf16 %v94_v21, %v94_v21 }
  0x96   :  { %169 = vmatmul.bf16.vlgmr.msra.gmra.mxu1 %v95_v22 }
  0x97   :  { %v92_v23 = vpop.f32.mrf.mxu0 }
 0x113   :  { %v170_v27 = vpop.f32.mrf.mxu1 }
 0x114   :  { %v171_v28 = vadd.f32 %v170_v27, %v112_v26 }
 0x116   :  { %v174_v29 = vmax.f32 %v171_v28, 0.0 }
 0x118   :  { %v175_v30 = vpack.c.bf16 %v174_v29, %v174_v29 }
 0x11a   :  { %249 = vmatmul.bf16.vlgmr.msra.gmra.mxu2 %v175_v30 }
 0x11b   :  { %v172_v31 = vpop.f32.mrf.mxu1 }
 0x19d   :  { %v250_v33 = vpop.f32.mrf.mxu2 }
 0x19e   :  { %v251_v34 = vadd.f32 %v250_v33, %v192_v32 }
 0x1a0   :  { %255 = vst.msk [vmem:[#allocation8] sm:$0xff] %vm254_vm1, %v251_v34 }
 0x1a1   :  { %266 = dma.vmem_to_hbm [thread:$0]  %s262_s11, 128, %s264_s14, [#allocation4]  }
 0x1a5   :  { %v252_v35 = vpop.f32.mrf.mxu2 }
 0x1a6   :  { %466 = dma.done.wait [#allocation4], 128  }
 0x1a7   :  { %467 = vsyncadd [#allocation4], 4294967168 }
 0x1a8   :  { %271 = vsyncpa [#allocation3], 1 }
 0x1a9   :  { %272 = vsyncpa [#allocation6], 1 }
 0x1aa   :  { %273 = vsyncpa [#allocation4], 1 }

</bundles_post_ra>
